<compile_context>
chip_gen: v5e
topology: v5e:2x2
jax: 0.10.0
libtpu: 0.0.40
codegen_flags: <defaults>
</compile_context>

<pallas_src>
import functools
import numpy as np

import jax
import jax.numpy as jnp
from jax.experimental import pallas as pl
from jax.experimental.pallas import tpu as pltpu


# ------------------------------ host-side helpers ---------------------------

def bsm(n, d):
    """Ring mask, identical construction to the PyTorch reference."""
    a = [[0] * n for _ in range(n)]
    p, q = 0, n - 1
    w = int((n + 1) / 2)
    t = 0
    while p < d:
        for i in range(p, q):
            a[p][i] = t
        for i in range(p, q):
            a[i][q] = t
        for i in range(q, p, -1):
            a[q][i] = t
        for i in range(q, p, -1):
            a[i][p] = t
        p += 1
        q -= 1
    while p == d or (p > d and p < q):
        for i in range(p, q):
            a[p][i] = 1
        for i in range(p, q):
            a[i][q] = 1
        for i in range(q, p, -1):
            a[q][i] = 1
        for i in range(q, p, -1):
            a[i][p] = 1
        a[w - 1][w - 1] = 1
        p += 1
        q -= 1
    return np.array(a)


def eca_kernel_size(c):
    gamma, b = 2, 3
    k = int(abs((np.log2(c) + b) / gamma))
    return k if k % 2 else k + 1


def eca_fold(wa, wm, C):
    """Fold the NCAM ECA 1-D conv (and its channel-reversal branch) into a
    single (C, C) matrix per branch:  y = M @ avg + bias.
    Returns M^T so the kernel can do a sublane-reduce mat-vec."""
    K = int(wa.shape[1])
    P = (K - 1) // 2
    sel0 = np.zeros((K, C, C), np.float32)   # forward branch (row 0 of conv)
    sel1 = np.zeros((K, C, C), np.float32)   # reversed branch (row 1 of conv)
    for j in range(K):
        for i in range(C):
            k = i + j - P
            if 0 <= k < C:
                sel0[j, i, k] = 1.0
                sel1[j, i, C - 1 - k] = 1.0
    wa = wa.astype(jnp.float32)
    wm = wm.astype(jnp.float32)
    sel0 = jnp.asarray(sel0)
    sel1 = jnp.asarray(sel1)
    Ma = jnp.tensordot(wa[0], sel0, axes=1) + jnp.tensordot(wa[1], sel1, axes=1)
    Mm = jnp.tensordot(wm[0], sel0, axes=1) + jnp.tensordot(wm[1], sel1, axes=1)
    return Ma.T, Mm.T


# ------------------------------- fused kernel -------------------------------

def _le_dsc3d_kernel(TB, nin, nout, D, H, W, S, SP, kc, kh, kw,
                     x_ref, cmask_ref, ring_ref,
                     ma1_ref, mm1_ref, ma2_ref, mm2_ref,
                     w3_ref, bsum_ref, pww_ref, pwb_ref, b1_ref, b2_ref,
                     o_ref):
    """TB batch elements per grid step.  x_ref: (TB, nin, D, SP), SP lane-dense."""
    pc, ph, pw = (kc - 1) // 2, (kh - 1) // 2, (kw - 1) // 2
    C1, C2 = nin * D, nout * D
    inv_s = 1.0 / float(S)

    # center tap mask == "valid lane" mask (ones on the S real lanes, 0 in pad)
    valid = cmask_ref[ph * kw + pw: ph * kw + pw + 1, :]          # (1, SP)
    ring = ring_ref[...]                                          # (1, SP)

    # depth-shift validity masks (kill the rows a sublane roll would wrap)
    d_iota = jax.lax.broadcasted_iota(jnp.int32, (D, SP), 0)
    dmask = {}
    for dd in range(-pc, pc + 1):
        if dd != 0:
            dmask[dd] = ((d_iota + dd >= 0) & (d_iota + dd < D)).astype(jnp.float32)

    def make_eye(C):
        r = jax.lax.broadcasted_iota(jnp.int32, (C, C), 0)
        c = jax.lax.broadcasted_iota(jnp.int32, (C, C), 1)
        return (r == c).astype(jnp.float32)

    eye1 = make_eye(C1)
    eye2 = eye1 if C2 == C1 else make_eye(C2)

    def ncam_att(xc, maT_ref, mmT_ref, b_ref, eye):
        """NCAM3D channel attention for xc (C, SP); returns the (C, 1) gate."""
        avg = jnp.sum(xc, axis=1, keepdims=True) * inv_s                 # (C, 1)
        avgm = jnp.sum(xc * ring, axis=1, keepdims=True) * inv_s         # (C, 1)
        # ECA conv folded into M: ya[i] = sum_k M[i,k]*avg[k] -> sublane reduce
        ya = jnp.sum(maT_ref[...] * avg, axis=0, keepdims=True) + b_ref[0]   # (1, C)
        ym = jnp.sum(mmT_ref[...] * avgm, axis=0, keepdims=True) + b_ref[1]  # (1, C)
        at = jax.nn.sigmoid((jax.nn.sigmoid(ya) * jax.nn.sigmoid(ym) - 0.2) * 2.0)
        # row -> column without a transpose op: identity mask + lane reduce
        return jnp.sum(at * eye, axis=1, keepdims=True)                  # (C, 1)

    for tb in range(TB):
        # -------- stage 1: three depthwise Conv3d folded into one tap cube ---
        dw_blocks = []
        for n in range(nin):
            xn = x_ref[tb, n]                                   # (D, SP)
            acc = bsum_ref[n] * valid                           # (1, SP) -> bcast
            for b in range(kh):
                for c in range(kw):
                    # cross-shaped support: at least one offset is central
                    taps = [a for a in range(kc) if (a == pc or b == ph or c == pw)]
                    if not taps:
                        continue
                    delta = (b - ph) * W + (c - pw)
                    if delta == 0:
                        t = xn                                  # pad lanes already 0
                    else:
                        msk = cmask_ref[b * kw + c: b * kw + c + 1, :]    # (1, SP)
                        t = pltpu.roll(xn, (-delta) % SP, axis=1) * msk
                    for a in taps:
                        dd = a - pc
                        wgt = w3_ref[(n * kc + a) * (kh * kw) + b * kw + c]
                        if dd == 0:
                            term = t
                        else:
                            term = pltpu.roll(t, (-dd) % D, axis=0) * dmask[dd]
                        acc = acc + wgt * term
            dw_blocks.append(acc)
        x1 = dw_blocks[0] if nin == 1 else jnp.concatenate(dw_blocks, axis=0)

        # -------- stage 2: NCAM3D (at1) --------------------------------------
        x1 = x1 * ncam_att(x1, ma1_ref, mm1_ref, b1_ref, eye1)

        # -------- stage 3: 1x1x1 pointwise conv, written straight to o_ref ---
        for m in range(nout):
            acc = pwb_ref[m] * valid
            for n in range(nin):
                acc = acc + pww_ref[m * nin + n] * x1[n * D:(n + 1) * D, :]
            o_ref[tb, m * D:(m + 1) * D, :] = acc

        # -------- stage 4: NCAM3D (at2), scaled in place ----------------------
        x2 = o_ref[tb]                                           # (C2, SP)
        o_ref[tb] = x2 * ncam_att(x2, ma2_ref, mm2_ref, b2_ref, eye2)


# ------------------------------ pallas wrapper -------------------------------

def le_dsc3d_forward(x, params, *, kc, kh, kw, patch_size):
    if x.ndim == 4:                          # (B, D, H, W) -> (B, 1, D, H, W)
        x = x[:, None, :, :, :]
    x = x.astype(jnp.float32)
    B, nin, D, H, W = x.shape
    assert H == patch_size and W == patch_size
    S = H * W
    SP = ((S + 127) // 128) * 128            # lane-dense padded width
    nout = params["pw_w"].shape[0]
    C1, C2 = nin * D, nout * D
    pc, ph, pw_ = (kc - 1) // 2, (kh - 1) // 2, (kw - 1) // 2

    # batch blocking: even parallel grid for v7x megacore; TB amortizes the
    # fixed per-grid-step cost on all generations.
    if B >= 2 and B % 2 == 0:
        G, TB = 2, B // 2
    else:
        G, TB = B, 1

    # ---- static host-side constants (folded once) ---------------------------
    ring = np.zeros((1, SP), np.float32)
    ring[0, :S] = np.asarray(bsm(W, (patch_size - 1) // 2 - 1), np.float32).reshape(S)
    cmask = np.zeros((kh * kw, SP), np.float32)
    for b in range(kh):
        for c in range(kw):
            dh, dw = b - ph, c - pw_
            m = np.zeros((H, W), np.float32)
            m[max(0, -dh):min(H, H - dh), max(0, -dw):min(W, W - dw)] = 1.0
            cmask[b * kw + c, :S] = m.reshape(S)

    # ---- fold the three depthwise kernels into one (nin, kc, kh, kw) cube ---
    w3 = jnp.zeros((nin, kc, kh, kw), jnp.float32)
    w3 = w3.at[:, :, ph, :].add(params["dw_cw_w"].astype(jnp.float32))
    w3 = w3.at[:, :, :, pw_].add(params["dw_ch_w"].astype(jnp.float32))
    w3 = w3.at[:, pc, :, :].add(params["dw_hw_w"].astype(jnp.float32))
    bsum = (params["dw_cw_b"] + params["dw_ch_b"] + params["dw_hw_b"]).astype(jnp.float32)

    # ---- fold each NCAM's ECA conv (+ channel reversal) into (C, C) mats ----
    ma1T, mm1T = eca_fold(params["at1_wa"], params["at1_wm"], C1)
    ma2T, mm2T = eca_fold(params["at2_wa"], params["at2_wm"], C2)
    b1 = jnp.stack([params["at1_ba"], params["at1_bm"]]).astype(jnp.float32)
    b2 = jnp.stack([params["at2_ba"], params["at2_bm"]]).astype(jnp.float32)

    # lane-pad the activation (zeros beyond H*W) so in-kernel rolls wrap into 0
    x_flat = x.reshape(B, nin, D, S)
    x_pad = jnp.pad(x_flat, ((0, 0), (0, 0), (0, 0), (0, SP - S)))

    kern = functools.partial(_le_dsc3d_kernel,
                             TB, nin, nout, D, H, W, S, SP, kc, kh, kw)
    out = pl.pallas_call(
        kern,
        out_shape=jax.ShapeDtypeStruct((B, C2, SP), jnp.float32),
        grid=(G,),
        in_specs=[
            pl.BlockSpec((TB, nin, D, SP), lambda g: (g, 0, 0, 0)),    # x (lane-padded)
            pl.BlockSpec((kh * kw, SP), lambda g: (0, 0)),             # conv validity masks
            pl.BlockSpec((1, SP), lambda g: (0, 0)),                   # bsm ring mask
            pl.BlockSpec((C1, C1), lambda g: (0, 0)),                  # NCAM1 ECA matrix (unmasked)^T
            pl.BlockSpec((C1, C1), lambda g: (0, 0)),                  # NCAM1 ECA matrix (masked)^T
            pl.BlockSpec((C2, C2), lambda g: (0, 0)),                  # NCAM2 ECA matrix (unmasked)^T
            pl.BlockSpec((C2, C2), lambda g: (0, 0)),                  # NCAM2 ECA matrix (masked)^T
            pl.BlockSpec(memory_space=pltpu.MemorySpace.SMEM),         # combined tap weights
            pl.BlockSpec(memory_space=pltpu.MemorySpace.SMEM),         # combined conv bias
            pl.BlockSpec(memory_space=pltpu.MemorySpace.SMEM),         # pointwise weight
            pl.BlockSpec(memory_space=pltpu.MemorySpace.SMEM),         # pointwise bias
            pl.BlockSpec(memory_space=pltpu.MemorySpace.SMEM),         # NCAM1 biases
            pl.BlockSpec(memory_space=pltpu.MemorySpace.SMEM),         # NCAM2 biases
        ],
        out_specs=pl.BlockSpec((TB, C2, SP), lambda g: (g, 0, 0)),
        compiler_params=pltpu.CompilerParams(
            dimension_semantics=("parallel",)),                        # 2 TCs on v7x
    )(x_pad, jnp.asarray(cmask), jnp.asarray(ring),
      ma1T, mm1T, ma2T, mm2T,
      w3.reshape(-1), bsum,
      params["pw_w"].reshape(-1).astype(jnp.float32),
      params["pw_b"].astype(jnp.float32),
      b1, b2)
    return out[..., :S].reshape(B, nout, D, H, W)


# ------------------------ pure-JAX reference (validation) --------------------

def le_dsc3d_reference(x, params, *, kc, kh, kw, patch_size):
    if x.ndim == 4:
        x = x[:, None, :, :, :]
    x = x.astype(jnp.float32)
    B, nin, D, H, W = x.shape
    pc, ph, pw_ = (kc - 1) // 2, (kh - 1) // 2, (kw - 1) // 2

    def dwconv(xx, w, bias, ks, pad):
        xp = jnp.pad(xx, ((0, 0), (0, 0), (pad[0],) * 2, (pad[1],) * 2, (pad[2],) * 2))
        out = jnp.zeros((B, nin, D, H, W), jnp.float32) + bias[None, :, None, None, None]
        for a in range(ks[0]):
            for bb in range(ks[1]):
                for cc in range(ks[2]):
                    out = out + w[:, a, bb, cc][None, :, None, None, None] * \
                        xp[:, :, a:a + D, bb:bb + H, cc:cc + W]
        return out

    out = (dwconv(x, params["dw_cw_w"][:, :, None, :], params["dw_cw_b"], (kc, 1, kw), (pc, 0, pw_))
           + dwconv(x, params["dw_ch_w"][:, :, :, None], params["dw_ch_b"], (kc, kh, 1), (pc, ph, 0))
           + dwconv(x, params["dw_hw_w"][:, None, :, :], params["dw_hw_b"], (1, kh, kw), (0, ph, pw_)))

    mask2d = jnp.asarray(bsm(W, (patch_size - 1) // 2 - 1), jnp.float32)

    def ncam_ref(x5, wa, ba, wm, bm):
        B_, n_, D_, H_, W_ = x5.shape
        C = n_ * D_
        xc = x5.reshape(B_, C, H_, W_)
        xm = xc * mask2d[None, None]
        avg = xc.mean(axis=(2, 3))
        avgm = xm.mean(axis=(2, 3))
        K = wa.shape[1]
        P = (K - 1) // 2

        def conv_rows(v, w, bb):
            vr = v[:, ::-1]
            vp = jnp.pad(v, ((0, 0), (P, P)))
            vrp = jnp.pad(vr, ((0, 0), (P, P)))
            y = jnp.full((B_, C), bb, jnp.float32)
            for j in range(K):
                y = y + w[0, j] * vp[:, j:j + C] + w[1, j] * vrp[:, j:j + C]
            return y

        ya = conv_rows(avg, wa, ba)
        ym = conv_rows(avgm, wm, bm)
        at = jax.nn.sigmoid((jax.nn.sigmoid(ya) * jax.nn.sigmoid(ym) - 0.2) * 2.0)
        return (xc * at[:, :, None, None]).reshape(B_, n_, D_, H_, W_)

    out = ncam_ref(out, params["at1_wa"], params["at1_ba"],
                   params["at1_wm"], params["at1_bm"])
    pw_w = params["pw_w"].astype(jnp.float32)
    pw_b = params["pw_b"].astype(jnp.float32)
    nout = pw_w.shape[0]
    out = jnp.stack([sum(pw_w[m, n] * out[:, n] for n in range(nin)) + pw_b[m]
                     for m in range(nout)], axis=1)
    out = ncam_ref(out, params["at2_wa"], params["at2_ba"],
                   params["at2_wm"], params["at2_bm"])
    return out


# ----------------------------------- params ----------------------------------

def init_params(key, nin, nout, kc, kh, kw, pca, patch):
    ks = jax.random.split(key, 12)

    def rnd(k, shape, scale=0.1):
        return scale * jax.random.normal(k, shape, dtype=jnp.float32)

    k1 = eca_kernel_size(nin * pca)
    k2 = eca_kernel_size(nout * pca)
    return dict(
        dw_cw_w=rnd(ks[0], (nin, kc, kw)), dw_cw_b=rnd(ks[1], (nin,)),
        dw_ch_w=rnd(ks[2], (nin, kc, kh)), dw_ch_b=rnd(ks[3], (nin,)),
        dw_hw_w=rnd(ks[4], (nin, kh, kw)), dw_hw_b=rnd(ks[5], (nin,)),
        pw_w=rnd(ks[6], (nout, nin)), pw_b=rnd(ks[7], (nout,)),
        at1_wa=rnd(ks[8], (2, k1)), at1_ba=jnp.float32(0.01),
        at1_wm=rnd(ks[9], (2, k1)), at1_bm=jnp.float32(-0.01),
        at2_wa=rnd(ks[10], (2, k2)), at2_ba=jnp.float32(0.02),
        at2_wm=rnd(ks[11], (2, k2)), at2_bm=jnp.float32(-0.02),
    )


if __name__ == "__main__":
    B, nin, nout = 2, 1, 2
    pca_components, patch_size = 8, 9           # D = 8, H = W = 9
    kc = kh = kw = 3

    key = jax.random.PRNGKey(0)
    kx, kp = jax.random.split(key)
    x = jax.random.normal(kx, (B, pca_components, patch_size, patch_size),
                          dtype=jnp.float32)
    params = init_params(kp, nin, nout, kc, kh, kw, pca_components, patch_size)

    fwd = jax.jit(functools.partial(le_dsc3d_forward,
                                    kc=kc, kh=kh, kw=kw,
                                    patch_size=patch_size))
    out = fwd(x, params)
    jax.block_until_ready(out)

    ref = le_dsc3d_reference(x, params, kc=kc, kh=kh, kw=kw,
                             patch_size=patch_size)
    assert out.shape == (B, nout, pca_components, patch_size, patch_size)
    assert bool(jnp.all(jnp.isfinite(out)))
    max_err = float(jnp.max(jnp.abs(out - ref)))
    assert max_err < 1e-4, f"mismatch vs reference: {max_err}"
    print("KERNEL_OK")
</pallas_src>

<mosaic_0001>
module attributes {stable_mosaic.version = 11 : i64} {
  func.func @_le_dsc3d_kernel(%arg0: i32, %arg1: memref<1x1x8x128xf32, #tpu.memory_space<vmem>>, %arg2: memref<9x128xf32, #tpu.memory_space<vmem>>, %arg3: memref<1x128xf32, #tpu.memory_space<vmem>>, %arg4: memref<8x8xf32, #tpu.memory_space<vmem>>, %arg5: memref<8x8xf32, #tpu.memory_space<vmem>>, %arg6: memref<16x16xf32, #tpu.memory_space<vmem>>, %arg7: memref<16x16xf32, #tpu.memory_space<vmem>>, %arg8: memref<27xf32, #tpu.memory_space<smem>>, %arg9: memref<1xf32, #tpu.memory_space<smem>>, %arg10: memref<2xf32, #tpu.memory_space<smem>>, %arg11: memref<2xf32, #tpu.memory_space<smem>>, %arg12: memref<2xf32, #tpu.memory_space<smem>>, %arg13: memref<2xf32, #tpu.memory_space<smem>>, %arg14: memref<1x16x128xf32, #tpu.memory_space<vmem>>) attributes {dimension_semantics = [#tpu.dimension_semantics<parallel>], iteration_bounds = array<i64: 2>, scalar_prefetch = 0 : i64, scratch_operands = 0 : i64, tpu.core_type = #tpu.core_type<tc>, window_params = [{transform_indices = @transform_0, window_bounds = array<i64: 1, 1, 8, 128>}, {pipeline_mode = #tpu.pipeline_mode<synchronous>, transform_indices = @transform_1, window_bounds = array<i64: 9, 128>}, {pipeline_mode = #tpu.pipeline_mode<synchronous>, transform_indices = @transform_2, window_bounds = array<i64: 1, 128>}, {pipeline_mode = #tpu.pipeline_mode<synchronous>, transform_indices = @transform_3, window_bounds = array<i64: 8, 8>}, {pipeline_mode = #tpu.pipeline_mode<synchronous>, transform_indices = @transform_4, window_bounds = array<i64: 8, 8>}, {pipeline_mode = #tpu.pipeline_mode<synchronous>, transform_indices = @transform_5, window_bounds = array<i64: 16, 16>}, {pipeline_mode = #tpu.pipeline_mode<synchronous>, transform_indices = @transform_6, window_bounds = array<i64: 16, 16>}, {transform_indices = @transform_7, window_bounds = array<i64: 27>}, {transform_indices = @transform_8, window_bounds = array<i64: 1>}, {transform_indices = @transform_9, window_bounds = array<i64: 2>}, {transform_indices = @transform_10, window_bounds = array<i64: 2>}, {transform_indices = @transform_11, window_bounds = array<i64: 2>}, {transform_indices = @transform_12, window_bounds = array<i64: 2>}, {transform_indices = @transform_13, window_bounds = array<i64: 1, 16, 128>}]} {
    %c4 = arith.constant 4 : index
    %c0 = arith.constant 0 : index
    %0 = vector.load %arg2[%c4, %c0] : memref<9x128xf32, #tpu.memory_space<vmem>>, vector<1x128xf32>
    %c0_0 = arith.constant 0 : index
    %c0_1 = arith.constant 0 : index
    %1 = vector.load %arg3[%c0_0, %c0_1] : memref<1x128xf32, #tpu.memory_space<vmem>>, vector<1x128xf32>
    %2 = tpu.iota {dimensions = array<i32: 0>} : vector<8x128xi32>
    %c-1_i32 = arith.constant -1 : i32
    %3 = vector.broadcast %c-1_i32 : i32 to vector<8x128xi32>
    %4 = arith.addi %2, %3 : vector<8x128xi32>
    %c0_i32 = arith.constant 0 : i32
    %5 = vector.broadcast %c0_i32 : i32 to vector<8x128xi32>
    %6 = arith.cmpi sge, %4, %5 : vector<8x128xi32>
    %c-1_i32_2 = arith.constant -1 : i32
    %7 = vector.broadcast %c-1_i32_2 : i32 to vector<8x128xi32>
    %8 = arith.addi %2, %7 : vector<8x128xi32>
    %c8_i32 = arith.constant 8 : i32
    %9 = vector.broadcast %c8_i32 : i32 to vector<8x128xi32>
    %10 = arith.cmpi slt, %8, %9 : vector<8x128xi32>
    %11 = arith.andi %6, %10 : vector<8x128xi1>
    %12 = arith.extui %11 : vector<8x128xi1> to vector<8x128xi32>
    %13 = arith.sitofp %12 : vector<8x128xi32> to vector<8x128xf32>
    %c1_i32 = arith.constant 1 : i32
    %14 = vector.broadcast %c1_i32 : i32 to vector<8x128xi32>
    %15 = arith.addi %2, %14 : vector<8x128xi32>
    %c0_i32_3 = arith.constant 0 : i32
    %16 = vector.broadcast %c0_i32_3 : i32 to vector<8x128xi32>
    %17 = arith.cmpi sge, %15, %16 : vector<8x128xi32>
    %c1_i32_4 = arith.constant 1 : i32
    %18 = vector.broadcast %c1_i32_4 : i32 to vector<8x128xi32>
    %19 = arith.addi %2, %18 : vector<8x128xi32>
    %c8_i32_5 = arith.constant 8 : i32
    %20 = vector.broadcast %c8_i32_5 : i32 to vector<8x128xi32>
    %21 = arith.cmpi slt, %19, %20 : vector<8x128xi32>
    %22 = arith.andi %17, %21 : vector<8x128xi1>
    %23 = arith.extui %22 : vector<8x128xi1> to vector<8x128xi32>
    %24 = arith.sitofp %23 : vector<8x128xi32> to vector<8x128xf32>
    %25 = tpu.iota {dimensions = array<i32: 0>} : vector<8x8xi32>
    %26 = tpu.iota {dimensions = array<i32: 1>} : vector<8x8xi32>
    %27 = arith.cmpi eq, %25, %26 : vector<8x8xi32>
    %28 = arith.extui %27 : vector<8x8xi1> to vector<8x8xi32>
    %29 = arith.sitofp %28 : vector<8x8xi32> to vector<8x8xf32>
    %30 = tpu.iota {dimensions = array<i32: 0>} : vector<16x16xi32>
    %31 = tpu.iota {dimensions = array<i32: 1>} : vector<16x16xi32>
    %32 = arith.cmpi eq, %30, %31 : vector<16x16xi32>
    %33 = arith.extui %32 : vector<16x16xi1> to vector<16x16xi32>
    %34 = arith.sitofp %33 : vector<16x16xi32> to vector<16x16xf32>
    %c0_6 = arith.constant 0 : index
    %c0_7 = arith.constant 0 : index
    %c0_8 = arith.constant 0 : index
    %c0_9 = arith.constant 0 : index
    %35 = vector.load %arg1[%c0_6, %c0_7, %c0_8, %c0_9] : memref<1x1x8x128xf32, #tpu.memory_space<vmem>>, vector<1x1x8x128xf32>
    %36 = vector.shape_cast %35 : vector<1x1x8x128xf32> to vector<8x128xf32>
    %c0_10 = arith.constant 0 : index
    %37 = memref.load %arg9[%c0_10] : memref<1xf32, #tpu.memory_space<smem>>
    %38 = vector.broadcast %37 : f32 to vector<1x128xf32>
    %39 = arith.mulf %38, %0 : vector<1x128xf32>
    %c0_11 = arith.constant 0 : index
    %c0_12 = arith.constant 0 : index
    %40 = vector.load %arg2[%c0_11, %c0_12] : memref<9x128xf32, #tpu.memory_space<vmem>>, vector<1x128xf32>
    %c10_i32 = arith.constant 10 : i32
    %41 = tpu.dynamic_rotate %36 by %c10_i32 dim 1 : vector<8x128xf32>, i32 -> vector<8x128xf32>
    %42 = vector.broadcast %40 : vector<1x128xf32> to vector<8x128xf32>
    %43 = arith.mulf %41, %42 : vector<8x128xf32>
    %c9 = arith.constant 9 : index
    %44 = memref.load %arg8[%c9] : memref<27xf32, #tpu.memory_space<smem>>
    %45 = vector.broadcast %44 : f32 to vector<8x128xf32>
    %46 = arith.mulf %45, %43 : vector<8x128xf32>
    %47 = vector.broadcast %39 : vector<1x128xf32> to vector<8x128xf32>
    %48 = arith.addf %47, %46 : vector<8x128xf32>
    %c1 = arith.constant 1 : index
    %c0_13 = arith.constant 0 : index
    %49 = vector.load %arg2[%c1, %c0_13] : memref<9x128xf32, #tpu.memory_space<vmem>>, vector<1x128xf32>
    %c9_i32 = arith.constant 9 : i32
    %50 = tpu.dynamic_rotate %36 by %c9_i32 dim 1 : vector<8x128xf32>, i32 -> vector<8x128xf32>
    %51 = vector.broadcast %49 : vector<1x128xf32> to vector<8x128xf32>
    %52 = arith.mulf %50, %51 : vector<8x128xf32>
    %c1_14 = arith.constant 1 : index
    %53 = memref.load %arg8[%c1_14] : memref<27xf32, #tpu.memory_space<smem>>
    %c1_i32_15 = arith.constant 1 : i32
    %54 = tpu.dynamic_rotate %52 by %c1_i32_15 dim 0 : vector<8x128xf32>, i32 -> vector<8x128xf32>
    %55 = arith.mulf %54, %13 : vector<8x128xf32>
    %56 = vector.broadcast %53 : f32 to vector<8x128xf32>
    %57 = arith.mulf %56, %55 : vector<8x128xf32>
    %58 = arith.addf %48, %57 : vector<8x128xf32>
    %c10 = arith.constant 10 : index
    %59 = memref.load %arg8[%c10] : memref<27xf32, #tpu.memory_space<smem>>
    %60 = vector.broadcast %59 : f32 to vector<8x128xf32>
    %61 = arith.mulf %60, %52 : vector<8x128xf32>
    %62 = arith.addf %58, %61 : vector<8x128xf32>
    %c19 = arith.constant 19 : index
    %63 = memref.load %arg8[%c19] : memref<27xf32, #tpu.memory_space<smem>>
    %c7_i32 = arith.constant 7 : i32
    %64 = tpu.dynamic_rotate %52 by %c7_i32 dim 0 : vector<8x128xf32>, i32 -> vector<8x128xf32>
    %65 = arith.mulf %64, %24 : vector<8x128xf32>
    %66 = vector.broadcast %63 : f32 to vector<8x128xf32>
    %67 = arith.mulf %66, %65 : vector<8x128xf32>
    %68 = arith.addf %62, %67 : vector<8x128xf32>
    %c2 = arith.constant 2 : index
    %c0_16 = arith.constant 0 : index
    %69 = vector.load %arg2[%c2, %c0_16] : memref<9x128xf32, #tpu.memory_space<vmem>>, vector<1x128xf32>
    %c8_i32_17 = arith.constant 8 : i32
    %70 = tpu.dynamic_rotate %36 by %c8_i32_17 dim 1 : vector<8x128xf32>, i32 -> vector<8x128xf32>
    %71 = vector.broadcast %69 : vector<1x128xf32> to vector<8x128xf32>
    %72 = arith.mulf %70, %71 : vector<8x128xf32>
    %c11 = arith.constant 11 : index
    %73 = memref.load %arg8[%c11] : memref<27xf32, #tpu.memory_space<smem>>
    %74 = vector.broadcast %73 : f32 to vector<8x128xf32>
    %75 = arith.mulf %74, %72 : vector<8x128xf32>
    %76 = arith.addf %68, %75 : vector<8x128xf32>
    %c3 = arith.constant 3 : index
    %c0_18 = arith.constant 0 : index
    %77 = vector.load %arg2[%c3, %c0_18] : memref<9x128xf32, #tpu.memory_space<vmem>>, vector<1x128xf32>
    %c1_i32_19 = arith.constant 1 : i32
    %78 = tpu.dynamic_rotate %36 by %c1_i32_19 dim 1 : vector<8x128xf32>, i32 -> vector<8x128xf32>
    %79 = vector.broadcast %77 : vector<1x128xf32> to vector<8x128xf32>
    %80 = arith.mulf %78, %79 : vector<8x128xf32>
    %c3_20 = arith.constant 3 : index
    %81 = memref.load %arg8[%c3_20] : memref<27xf32, #tpu.memory_space<smem>>
    %c1_i32_21 = arith.constant 1 : i32
    %82 = tpu.dynamic_rotate %80 by %c1_i32_21 dim 0 : vector<8x128xf32>, i32 -> vector<8x128xf32>
    %83 = arith.mulf %82, %13 : vector<8x128xf32>
    %84 = vector.broadcast %81 : f32 to vector<8x128xf32>
    %85 = arith.mulf %84, %83 : vector<8x128xf32>
    %86 = arith.addf %76, %85 : vector<8x128xf32>
    %c12 = arith.constant 12 : index
    %87 = memref.load %arg8[%c12] : memref<27xf32, #tpu.memory_space<smem>>
    %88 = vector.broadcast %87 : f32 to vector<8x128xf32>
    %89 = arith.mulf %88, %80 : vector<8x128xf32>
    %90 = arith.addf %86, %89 : vector<8x128xf32>
    %c21 = arith.constant 21 : index
    %91 = memref.load %arg8[%c21] : memref<27xf32, #tpu.memory_space<smem>>
    %c7_i32_22 = arith.constant 7 : i32
    %92 = tpu.dynamic_rotate %80 by %c7_i32_22 dim 0 : vector<8x128xf32>, i32 -> vector<8x128xf32>
    %93 = arith.mulf %92, %24 : vector<8x128xf32>
    %94 = vector.broadcast %91 : f32 to vector<8x128xf32>
    %95 = arith.mulf %94, %93 : vector<8x128xf32>
    %96 = arith.addf %90, %95 : vector<8x128xf32>
    %c4_23 = arith.constant 4 : index
    %97 = memref.load %arg8[%c4_23] : memref<27xf32, #tpu.memory_space<smem>>
    %c1_i32_24 = arith.constant 1 : i32
    %98 = tpu.dynamic_rotate %36 by %c1_i32_24 dim 0 : vector<8x128xf32>, i32 -> vector<8x128xf32>
    %99 = arith.mulf %98, %13 : vector<8x128xf32>
    %100 = vector.broadcast %97 : f32 to vector<8x128xf32>
    %101 = arith.mulf %100, %99 : vector<8x128xf32>
    %102 = arith.addf %96, %101 : vector<8x128xf32>
    %c13 = arith.constant 13 : index
    %103 = memref.load %arg8[%c13] : memref<27xf32, #tpu.memory_space<smem>>
    %104 = vector.broadcast %103 : f32 to vector<8x128xf32>
    %105 = arith.mulf %104, %36 : vector<8x128xf32>
    %106 = arith.addf %102, %105 : vector<8x128xf32>
    %c22 = arith.constant 22 : index
    %107 = memref.load %arg8[%c22] : memref<27xf32, #tpu.memory_space<smem>>
    %c7_i32_25 = arith.constant 7 : i32
    %108 = tpu.dynamic_rotate %36 by %c7_i32_25 dim 0 : vector<8x128xf32>, i32 -> vector<8x128xf32>
    %109 = arith.mulf %108, %24 : vector<8x128xf32>
    %110 = vector.broadcast %107 : f32 to vector<8x128xf32>
    %111 = arith.mulf %110, %109 : vector<8x128xf32>
    %112 = arith.addf %106, %111 : vector<8x128xf32>
    %c5 = arith.constant 5 : index
    %c0_26 = arith.constant 0 : index
    %113 = vector.load %arg2[%c5, %c0_26] : memref<9x128xf32, #tpu.memory_space<vmem>>, vector<1x128xf32>
    %c127_i32 = arith.constant 127 : i32
    %114 = tpu.dynamic_rotate %36 by %c127_i32 dim 1 : vector<8x128xf32>, i32 -> vector<8x128xf32>
    %115 = vector.broadcast %113 : vector<1x128xf32> to vector<8x128xf32>
    %116 = arith.mulf %114, %115 : vector<8x128xf32>
    %c5_27 = arith.constant 5 : index
    %117 = memref.load %arg8[%c5_27] : memref<27xf32, #tpu.memory_space<smem>>
    %c1_i32_28 = arith.constant 1 : i32
    %118 = tpu.dynamic_rotate %116 by %c1_i32_28 dim 0 : vector<8x128xf32>, i32 -> vector<8x128xf32>
    %119 = arith.mulf %118, %13 : vector<8x128xf32>
    %120 = vector.broadcast %117 : f32 to vector<8x128xf32>
    %121 = arith.mulf %120, %119 : vector<8x128xf32>
    %122 = arith.addf %112, %121 : vector<8x128xf32>
    %c14 = arith.constant 14 : index
    %123 = memref.load %arg8[%c14] : memref<27xf32, #tpu.memory_space<smem>>
    %124 = vector.broadcast %123 : f32 to vector<8x128xf32>
    %125 = arith.mulf %124, %116 : vector<8x128xf32>
    %126 = arith.addf %122, %125 : vector<8x128xf32>
    %c23 = arith.constant 23 : index
    %127 = memref.load %arg8[%c23] : memref<27xf32, #tpu.memory_space<smem>>
    %c7_i32_29 = arith.constant 7 : i32
    %128 = tpu.dynamic_rotate %116 by %c7_i32_29 dim 0 : vector<8x128xf32>, i32 -> vector<8x128xf32>
    %129 = arith.mulf %128, %24 : vector<8x128xf32>
    %130 = vector.broadcast %127 : f32 to vector<8x128xf32>
    %131 = arith.mulf %130, %129 : vector<8x128xf32>
    %132 = arith.addf %126, %131 : vector<8x128xf32>
    %c6 = arith.constant 6 : index
    %c0_30 = arith.constant 0 : index
    %133 = vector.load %arg2[%c6, %c0_30] : memref<9x128xf32, #tpu.memory_space<vmem>>, vector<1x128xf32>
    %c120_i32 = arith.constant 120 : i32
    %134 = tpu.dynamic_rotate %36 by %c120_i32 dim 1 : vector<8x128xf32>, i32 -> vector<8x128xf32>
    %135 = vector.broadcast %133 : vector<1x128xf32> to vector<8x128xf32>
    %136 = arith.mulf %134, %135 : vector<8x128xf32>
    %c15 = arith.constant 15 : index
    %137 = memref.load %arg8[%c15] : memref<27xf32, #tpu.memory_space<smem>>
    %138 = vector.broadcast %137 : f32 to vector<8x128xf32>
    %139 = arith.mulf %138, %136 : vector<8x128xf32>
    %140 = arith.addf %132, %139 : vector<8x128xf32>
    %c7 = arith.constant 7 : index
    %c0_31 = arith.constant 0 : index
    %141 = vector.load %arg2[%c7, %c0_31] : memref<9x128xf32, #tpu.memory_space<vmem>>, vector<1x128xf32>
    %c119_i32 = arith.constant 119 : i32
    %142 = tpu.dynamic_rotate %36 by %c119_i32 dim 1 : vector<8x128xf32>, i32 -> vector<8x128xf32>
    %143 = vector.broadcast %141 : vector<1x128xf32> to vector<8x128xf32>
    %144 = arith.mulf %142, %143 : vector<8x128xf32>
    %c7_32 = arith.constant 7 : index
    %145 = memref.load %arg8[%c7_32] : memref<27xf32, #tpu.memory_space<smem>>
    %c1_i32_33 = arith.constant 1 : i32
    %146 = tpu.dynamic_rotate %144 by %c1_i32_33 dim 0 : vector<8x128xf32>, i32 -> vector<8x128xf32>
    %147 = arith.mulf %146, %13 : vector<8x128xf32>
    %148 = vector.broadcast %145 : f32 to vector<8x128xf32>
    %149 = arith.mulf %148, %147 : vector<8x128xf32>
    %150 = arith.addf %140, %149 : vector<8x128xf32>
    %c16 = arith.constant 16 : index
    %151 = memref.load %arg8[%c16] : memref<27xf32, #tpu.memory_space<smem>>
    %152 = vector.broadcast %151 : f32 to vector<8x128xf32>
    %153 = arith.mulf %152, %144 : vector<8x128xf32>
    %154 = arith.addf %150, %153 : vector<8x128xf32>
    %c25 = arith.constant 25 : index
    %155 = memref.load %arg8[%c25] : memref<27xf32, #tpu.memory_space<smem>>
    %c7_i32_34 = arith.constant 7 : i32
    %156 = tpu.dynamic_rotate %144 by %c7_i32_34 dim 0 : vector<8x128xf32>, i32 -> vector<8x128xf32>
    %157 = arith.mulf %156, %24 : vector<8x128xf32>
    %158 = vector.broadcast %155 : f32 to vector<8x128xf32>
    %159 = arith.mulf %158, %157 : vector<8x128xf32>
    %160 = arith.addf %154, %159 : vector<8x128xf32>
    %c8 = arith.constant 8 : index
    %c0_35 = arith.constant 0 : index
    %161 = vector.load %arg2[%c8, %c0_35] : memref<9x128xf32, #tpu.memory_space<vmem>>, vector<1x128xf32>
    %c118_i32 = arith.constant 118 : i32
    %162 = tpu.dynamic_rotate %36 by %c118_i32 dim 1 : vector<8x128xf32>, i32 -> vector<8x128xf32>
    %163 = vector.broadcast %161 : vector<1x128xf32> to vector<8x128xf32>
    %164 = arith.mulf %162, %163 : vector<8x128xf32>
    %c17 = arith.constant 17 : index
    %165 = memref.load %arg8[%c17] : memref<27xf32, #tpu.memory_space<smem>>
    %166 = vector.broadcast %165 : f32 to vector<8x128xf32>
    %167 = arith.mulf %166, %164 : vector<8x128xf32>
    %168 = arith.addf %160, %167 : vector<8x128xf32>
    %cst = arith.constant dense<0.000000e+00> : vector<8xf32>
    %169 = vector.multi_reduction <add>, %168, %cst [1] : vector<8x128xf32> to vector<8xf32>
    %170 = vector.shape_cast %169 : vector<8xf32> to vector<8x1xf32>
    %cst_36 = arith.constant 0.0123456791 : f32
    %171 = vector.broadcast %cst_36 : f32 to vector<8x1xf32>
    %172 = arith.mulf %170, %171 : vector<8x1xf32>
    %173 = vector.broadcast %1 : vector<1x128xf32> to vector<8x128xf32>
    %174 = arith.mulf %168, %173 : vector<8x128xf32>
    %cst_37 = arith.constant dense<0.000000e+00> : vector<8xf32>
    %175 = vector.multi_reduction <add>, %174, %cst_37 [1] : vector<8x128xf32> to vector<8xf32>
    %176 = vector.shape_cast %175 : vector<8xf32> to vector<8x1xf32>
    %cst_38 = arith.constant 0.0123456791 : f32
    %177 = vector.broadcast %cst_38 : f32 to vector<8x1xf32>
    %178 = arith.mulf %176, %177 : vector<8x1xf32>
    %c0_39 = arith.constant 0 : index
    %c0_40 = arith.constant 0 : index
    %179 = vector.load %arg4[%c0_39, %c0_40] : memref<8x8xf32, #tpu.memory_space<vmem>>, vector<8x8xf32>
    %180 = vector.broadcast %172 : vector<8x1xf32> to vector<8x8xf32>
    %181 = arith.mulf %179, %180 : vector<8x8xf32>
    %cst_41 = arith.constant dense<0.000000e+00> : vector<8xf32>
    %182 = vector.multi_reduction <add>, %181, %cst_41 [0] : vector<8x8xf32> to vector<8xf32>
    %183 = vector.shape_cast %182 : vector<8xf32> to vector<1x8xf32>
    %c0_42 = arith.constant 0 : index
    %184 = memref.load %arg12[%c0_42] : memref<2xf32, #tpu.memory_space<smem>>
    %185 = vector.broadcast %184 : f32 to vector<1x8xf32>
    %186 = arith.addf %183, %185 : vector<1x8xf32>
    %c0_43 = arith.constant 0 : index
    %c0_44 = arith.constant 0 : index
    %187 = vector.load %arg5[%c0_43, %c0_44] : memref<8x8xf32, #tpu.memory_space<vmem>>, vector<8x8xf32>
    %188 = vector.broadcast %178 : vector<8x1xf32> to vector<8x8xf32>
    %189 = arith.mulf %187, %188 : vector<8x8xf32>
    %cst_45 = arith.constant dense<0.000000e+00> : vector<8xf32>
    %190 = vector.multi_reduction <add>, %189, %cst_45 [0] : vector<8x8xf32> to vector<8xf32>
    %191 = vector.shape_cast %190 : vector<8xf32> to vector<1x8xf32>
    %c1_46 = arith.constant 1 : index
    %192 = memref.load %arg12[%c1_46] : memref<2xf32, #tpu.memory_space<smem>>
    %193 = vector.broadcast %192 : f32 to vector<1x8xf32>
    %194 = arith.addf %191, %193 : vector<1x8xf32>
    %195 = arith.negf %186 : vector<1x8xf32>
    %196 = math.exp %195 : vector<1x8xf32>
    %cst_47 = arith.constant 1.000000e+00 : f32
    %197 = vector.broadcast %cst_47 : f32 to vector<1x8xf32>
    %198 = arith.addf %197, %196 : vector<1x8xf32>
    %199 = arith.divf %197, %198 : vector<1x8xf32>
    %200 = arith.negf %194 : vector<1x8xf32>
    %201 = math.exp %200 : vector<1x8xf32>
    %cst_48 = arith.constant 1.000000e+00 : f32
    %202 = vector.broadcast %cst_48 : f32 to vector<1x8xf32>
    %203 = arith.addf %202, %201 : vector<1x8xf32>
    %204 = arith.divf %202, %203 : vector<1x8xf32>
    %205 = arith.mulf %199, %204 : vector<1x8xf32>
    %cst_49 = arith.constant 2.000000e-01 : f32
    %206 = vector.broadcast %cst_49 : f32 to vector<1x8xf32>
    %207 = arith.subf %205, %206 : vector<1x8xf32>
    %cst_50 = arith.constant 2.000000e+00 : f32
    %208 = vector.broadcast %cst_50 : f32 to vector<1x8xf32>
    %209 = arith.mulf %207, %208 : vector<1x8xf32>
    %210 = arith.negf %209 : vector<1x8xf32>
    %211 = math.exp %210 : vector<1x8xf32>
    %cst_51 = arith.constant 1.000000e+00 : f32
    %212 = vector.broadcast %cst_51 : f32 to vector<1x8xf32>
    %213 = arith.addf %212, %211 : vector<1x8xf32>
    %214 = arith.divf %212, %213 : vector<1x8xf32>
    %215 = vector.broadcast %214 : vector<1x8xf32> to vector<8x8xf32>
    %216 = arith.mulf %215, %29 : vector<8x8xf32>
    %cst_52 = arith.constant dense<0.000000e+00> : vector<8xf32>
    %217 = vector.multi_reduction <add>, %216, %cst_52 [1] : vector<8x8xf32> to vector<8xf32>
    %218 = vector.shape_cast %217 : vector<8xf32> to vector<8x1xf32>
    %219 = vector.broadcast %218 : vector<8x1xf32> to vector<8x128xf32>
    %220 = arith.mulf %168, %219 : vector<8x128xf32>
    %c0_53 = arith.constant 0 : index
    %221 = memref.load %arg11[%c0_53] : memref<2xf32, #tpu.memory_space<smem>>
    %222 = vector.broadcast %221 : f32 to vector<1x128xf32>
    %223 = arith.mulf %222, %0 : vector<1x128xf32>
    %c0_54 = arith.constant 0 : index
    %224 = memref.load %arg10[%c0_54] : memref<2xf32, #tpu.memory_space<smem>>
    %225 = vector.broadcast %224 : f32 to vector<8x128xf32>
    %226 = arith.mulf %225, %220 : vector<8x128xf32>
    %227 = vector.broadcast %223 : vector<1x128xf32> to vector<8x128xf32>
    %228 = arith.addf %227, %226 : vector<8x128xf32>
    %c0_55 = arith.constant 0 : index
    %c0_56 = arith.constant 0 : index
    %c0_57 = arith.constant 0 : index
    %229 = vector.load %arg14[%c0_55, %c0_56, %c0_57] : memref<1x16x128xf32, #tpu.memory_space<vmem>>, vector<1x8x128xf32>
    %230 = vector.shape_cast %229 : vector<1x8x128xf32> to vector<8x128xf32>
    %231 = vector.shape_cast %228 : vector<8x128xf32> to vector<1x8x128xf32>
    tpu.vector_store %arg14[%c0_55, %c0_56, %c0_57], %231 {strides = array<i32>} : memref<1x16x128xf32, #tpu.memory_space<vmem>>, vector<1x8x128xf32>,
    %c1_58 = arith.constant 1 : index
    %232 = memref.load %arg11[%c1_58] : memref<2xf32, #tpu.memory_space<smem>>
    %233 = vector.broadcast %232 : f32 to vector<1x128xf32>
    %234 = arith.mulf %233, %0 : vector<1x128xf32>
    %c1_59 = arith.constant 1 : index
    %235 = memref.load %arg10[%c1_59] : memref<2xf32, #tpu.memory_space<smem>>
    %236 = vector.broadcast %235 : f32 to vector<8x128xf32>
    %237 = arith.mulf %236, %220 : vector<8x128xf32>
    %238 = vector.broadcast %234 : vector<1x128xf32> to vector<8x128xf32>
    %239 = arith.addf %238, %237 : vector<8x128xf32>
    %c0_60 = arith.constant 0 : index
    %c8_61 = arith.constant 8 : index
    %c0_62 = arith.constant 0 : index
    %240 = vector.load %arg14[%c0_60, %c8_61, %c0_62] : memref<1x16x128xf32, #tpu.memory_space<vmem>>, vector<1x8x128xf32>
    %241 = vector.shape_cast %240 : vector<1x8x128xf32> to vector<8x128xf32>
    %242 = vector.shape_cast %239 : vector<8x128xf32> to vector<1x8x128xf32>
    tpu.vector_store %arg14[%c0_60, %c8_61, %c0_62], %242 {strides = array<i32>} : memref<1x16x128xf32, #tpu.memory_space<vmem>>, vector<1x8x128xf32>,
    %c0_63 = arith.constant 0 : index
    %c0_64 = arith.constant 0 : index
    %c0_65 = arith.constant 0 : index
    %243 = vector.load %arg14[%c0_63, %c0_64, %c0_65] : memref<1x16x128xf32, #tpu.memory_space<vmem>>, vector<1x16x128xf32>
    %244 = vector.shape_cast %243 : vector<1x16x128xf32> to vector<16x128xf32>
    %cst_66 = arith.constant dense<0.000000e+00> : vector<16xf32>
    %245 = vector.multi_reduction <add>, %244, %cst_66 [1] : vector<16x128xf32> to vector<16xf32>
    %246 = vector.shape_cast %245 : vector<16xf32> to vector<16x1xf32>
    %cst_67 = arith.constant 0.0123456791 : f32
    %247 = vector.broadcast %cst_67 : f32 to vector<16x1xf32>
    %248 = arith.mulf %246, %247 : vector<16x1xf32>
    %249 = vector.broadcast %1 : vector<1x128xf32> to vector<16x128xf32>
    %250 = arith.mulf %244, %249 : vector<16x128xf32>
    %cst_68 = arith.constant dense<0.000000e+00> : vector<16xf32>
    %251 = vector.multi_reduction <add>, %250, %cst_68 [1] : vector<16x128xf32> to vector<16xf32>
    %252 = vector.shape_cast %251 : vector<16xf32> to vector<16x1xf32>
    %cst_69 = arith.constant 0.0123456791 : f32
    %253 = vector.broadcast %cst_69 : f32 to vector<16x1xf32>
    %254 = arith.mulf %252, %253 : vector<16x1xf32>
    %c0_70 = arith.constant 0 : index
    %c0_71 = arith.constant 0 : index
    %255 = vector.load %arg6[%c0_70, %c0_71] : memref<16x16xf32, #tpu.memory_space<vmem>>, vector<16x16xf32>
    %256 = vector.broadcast %248 : vector<16x1xf32> to vector<16x16xf32>
    %257 = arith.mulf %255, %256 : vector<16x16xf32>
    %cst_72 = arith.constant dense<0.000000e+00> : vector<16xf32>
    %258 = vector.multi_reduction <add>, %257, %cst_72 [0] : vector<16x16xf32> to vector<16xf32>
    %259 = vector.shape_cast %258 : vector<16xf32> to vector<1x16xf32>
    %c0_73 = arith.constant 0 : index
    %260 = memref.load %arg13[%c0_73] : memref<2xf32, #tpu.memory_space<smem>>
    %261 = vector.broadcast %260 : f32 to vector<1x16xf32>
    %262 = arith.addf %259, %261 : vector<1x16xf32>
    %c0_74 = arith.constant 0 : index
    %c0_75 = arith.constant 0 : index
    %263 = vector.load %arg7[%c0_74, %c0_75] : memref<16x16xf32, #tpu.memory_space<vmem>>, vector<16x16xf32>
    %264 = vector.broadcast %254 : vector<16x1xf32> to vector<16x16xf32>
    %265 = arith.mulf %263, %264 : vector<16x16xf32>
    %cst_76 = arith.constant dense<0.000000e+00> : vector<16xf32>
    %266 = vector.multi_reduction <add>, %265, %cst_76 [0] : vector<16x16xf32> to vector<16xf32>
    %267 = vector.shape_cast %266 : vector<16xf32> to vector<1x16xf32>
    %c1_77 = arith.constant 1 : index
    %268 = memref.load %arg13[%c1_77] : memref<2xf32, #tpu.memory_space<smem>>
    %269 = vector.broadcast %268 : f32 to vector<1x16xf32>
    %270 = arith.addf %267, %269 : vector<1x16xf32>
    %271 = arith.negf %262 : vector<1x16xf32>
    %272 = math.exp %271 : vector<1x16xf32>
    %cst_78 = arith.constant 1.000000e+00 : f32
    %273 = vector.broadcast %cst_78 : f32 to vector<1x16xf32>
    %274 = arith.addf %273, %272 : vector<1x16xf32>
    %275 = arith.divf %273, %274 : vector<1x16xf32>
    %276 = arith.negf %270 : vector<1x16xf32>
    %277 = math.exp %276 : vector<1x16xf32>
    %cst_79 = arith.constant 1.000000e+00 : f32
    %278 = vector.broadcast %cst_79 : f32 to vector<1x16xf32>
    %279 = arith.addf %278, %277 : vector<1x16xf32>
    %280 = arith.divf %278, %279 : vector<1x16xf32>
    %281 = arith.mulf %275, %280 : vector<1x16xf32>
    %cst_80 = arith.constant 2.000000e-01 : f32
    %282 = vector.broadcast %cst_80 : f32 to vector<1x16xf32>
    %283 = arith.subf %281, %282 : vector<1x16xf32>
    %cst_81 = arith.constant 2.000000e+00 : f32
    %284 = vector.broadcast %cst_81 : f32 to vector<1x16xf32>
    %285 = arith.mulf %283, %284 : vector<1x16xf32>
    %286 = arith.negf %285 : vector<1x16xf32>
    %287 = math.exp %286 : vector<1x16xf32>
    %cst_82 = arith.constant 1.000000e+00 : f32
    %288 = vector.broadcast %cst_82 : f32 to vector<1x16xf32>
    %289 = arith.addf %288, %287 : vector<1x16xf32>
    %290 = arith.divf %288, %289 : vector<1x16xf32>
    %291 = vector.broadcast %290 : vector<1x16xf32> to vector<16x16xf32>
    %292 = arith.mulf %291, %34 : vector<16x16xf32>
    %cst_83 = arith.constant dense<0.000000e+00> : vector<16xf32>
    %293 = vector.multi_reduction <add>, %292, %cst_83 [1] : vector<16x16xf32> to vector<16xf32>
    %294 = vector.shape_cast %293 : vector<16xf32> to vector<16x1xf32>
    %295 = vector.broadcast %294 : vector<16x1xf32> to vector<16x128xf32>
    %296 = arith.mulf %244, %295 : vector<16x128xf32>
    %c0_84 = arith.constant 0 : index
    %c0_85 = arith.constant 0 : index
    %c0_86 = arith.constant 0 : index
    %297 = vector.load %arg14[%c0_84, %c0_85, %c0_86] : memref<1x16x128xf32, #tpu.memory_space<vmem>>, vector<1x16x128xf32>
    %298 = vector.shape_cast %297 : vector<1x16x128xf32> to vector<16x128xf32>
    %299 = vector.shape_cast %296 : vector<16x128xf32> to vector<1x16x128xf32>
    tpu.vector_store %arg14[%c0_84, %c0_85, %c0_86], %299 {strides = array<i32>} : memref<1x16x128xf32, #tpu.memory_space<vmem>>, vector<1x16x128xf32>,
    return
  }
  func.func @transform_0(%arg0: i32) -> (i32, i32, i32, i32) {
    %c0_i32 = arith.constant 0 : i32
    %c0_i32_0 = arith.constant 0 : i32
    %c0_i32_1 = arith.constant 0 : i32
    %c0_i32_2 = arith.constant 0 : i32
    return %arg0, %c0_i32, %c0_i32_0, %c0_i32_1 : i32, i32, i32, i32
  }
  func.func @transform_1(%arg0: i32) -> (i32, i32) {
    %c0_i32 = arith.constant 0 : i32
    %c0_i32_0 = arith.constant 0 : i32
    %c0_i32_1 = arith.constant 0 : i32
    return %c0_i32, %c0_i32_0 : i32, i32
  }
  func.func @transform_2(%arg0: i32) -> (i32, i32) {
    %c0_i32 = arith.constant 0 : i32
    %c0_i32_0 = arith.constant 0 : i32
    %c0_i32_1 = arith.constant 0 : i32
    return %c0_i32, %c0_i32_0 : i32, i32
  }
  func.func @transform_3(%arg0: i32) -> (i32, i32) {
    %c0_i32 = arith.constant 0 : i32
    %c0_i32_0 = arith.constant 0 : i32
    %c0_i32_1 = arith.constant 0 : i32
    return %c0_i32, %c0_i32_0 : i32, i32
  }
  func.func @transform_4(%arg0: i32) -> (i32, i32) {
    %c0_i32 = arith.constant 0 : i32
    %c0_i32_0 = arith.constant 0 : i32
    %c0_i32_1 = arith.constant 0 : i32
    return %c0_i32, %c0_i32_0 : i32, i32
  }
  func.func @transform_5(%arg0: i32) -> (i32, i32) {
    %c0_i32 = arith.constant 0 : i32
    %c0_i32_0 = arith.constant 0 : i32
    %c0_i32_1 = arith.constant 0 : i32
    return %c0_i32, %c0_i32_0 : i32, i32
  }
  func.func @transform_6(%arg0: i32) -> (i32, i32) {
    %c0_i32 = arith.constant 0 : i32
    %c0_i32_0 = arith.constant 0 : i32
    %c0_i32_1 = arith.constant 0 : i32
    return %c0_i32, %c0_i32_0 : i32, i32
  }
  func.func @transform_7(%arg0: i32) -> i32 {
    %c0_i32 = arith.constant 0 : i32
    %c0_i32_0 = arith.constant 0 : i32
    return %c0_i32 : i32
  }
  func.func @transform_8(%arg0: i32) -> i32 {
    %c0_i32 = arith.constant 0 : i32
    %c0_i32_0 = arith.constant 0 : i32
    return %c0_i32 : i32
  }
  func.func @transform_9(%arg0: i32) -> i32 {
    %c0_i32 = arith.constant 0 : i32
    %c0_i32_0 = arith.constant 0 : i32
    return %c0_i32 : i32
  }
  func.func @transform_10(%arg0: i32) -> i32 {
    %c0_i32 = arith.constant 0 : i32
    %c0_i32_0 = arith.constant 0 : i32
    return %c0_i32 : i32
  }
  func.func @transform_11(%arg0: i32) -> i32 {
    %c0_i32 = arith.constant 0 : i32
    %c0_i32_0 = arith.constant 0 : i32
    return %c0_i32 : i32
  }
  func.func @transform_12(%arg0: i32) -> i32 {
    %c0_i32 = arith.constant 0 : i32
    %c0_i32_0 = arith.constant 0 : i32
    return %c0_i32 : i32
  }
  func.func @transform_13(%arg0: i32) -> (i32, i32, i32) {
    %c0_i32 = arith.constant 0 : i32
    %c0_i32_0 = arith.constant 0 : i32
    %c0_i32_1 = arith.constant 0 : i32
    return %arg0, %c0_i32, %c0_i32_0 : i32, i32, i32
  }
}

</mosaic_0001>

<bundles_post_ra>
// kernel: le_dsc3d_forward.1
= control target key start
LH: loop header
LB: loop body
LE: loop exit
PB: predicated region body
PF: predicated region fallthrough
CT: control target
= control target key end

     0   :  { %s1600_s0 = inlined_call_operand.vmem [shape: f32[2,1,8,128], index: 0, kind: input, shape index: {}]   ;;  %s1601_s1 = inlined_call_operand.vmem [shape: f32[9,128], index: 1, kind: input, shape index: {}]   ;;  %s1602_s2 = inlined_call_operand.vmem [shape: f32[1,128], index: 2, kind: input, shape index: {}]   ;;  %s1603_s3 = inlined_call_operand.vmem [shape: f32[8,8], index: 3, kind: input, shape index: {}]   ;;  %s1604_s4 = inlined_call_operand.vmem [shape: f32[8,8], index: 4, kind: input, shape index: {}]   ;;  %s1605_s5 = inlined_call_operand.vmem [shape: f32[16,16], index: 5, kind: input, shape index: {}]   ;;  %s1606_s6 = inlined_call_operand.vmem [shape: f32[16,16], index: 6, kind: input, shape index: {}]   ;;  %s1607_s7 = inlined_call_operand.vmem [shape: f32[27], index: 7, kind: input, shape index: {}]   ;;  %s1608_s8 = inlined_call_operand.<no memory space> [shape: f32[1], index: 8, kind: input, shape index: {}]   ;;  %s1609_s9 = inlined_call_operand.vmem [shape: f32[2], index: 9, kind: input, shape index: {}]   ;;  %s1610_s10 = inlined_call_operand.vmem [shape: f32[2], index: 10, kind: input, shape index: {}]   ;;  %s1611_s11 = inlined_call_operand.vmem [shape: f32[2], index: 11, kind: input, shape index: {}]   ;;  %s1612_s12 = inlined_call_operand.vmem [shape: f32[2], index: 12, kind: input, shape index: {}]   ;;  %s1613_s13 = inlined_call_operand.vmem [shape: f32[2,16,128], index: 13, kind: output, shape index: {}]  }
   0x1   :  { %18 = sst [smem:[#allocation2]] %s1608_s8 }
   0x2   :  { %19 = vsyncpa [#allocation4], 0 }
   0x3   :  { %20 = vsyncpa [#allocation6], 0 }
   0x4   :  { %21 = vsyncpa [#allocation9], 0  ;;  %s1352_s27 = smov 0  }
   0x5 LB: > { %s379_s30 = sshll.u32 %s1609_s9, 4  ;;  %s1361_s14 = sadd.s32 4294967295, %s1263_s27   ;;  %s1263_s27 = sphi %s1352_s27, %s27_s27   ;;  %s380_s30 = int_to_ptr.vmem [resolvable:$true] %s379_s30 }
   0x6   : > { %p1015_p0 = scmp.ge.s32.totalorder %s1263_s27, 1  ;;  %p336_p1 = scmp.lt.s32.totalorder %s1263_s27, 3 }
   0x7   : > { %p1105_p2 = scmp.eq.s32.totalorder %s1361_s14, 0  ;;  %s399_s17 = sshll.u32 %s1611_s11, 4  ;;  %s400_s17 = int_to_ptr.vmem [resolvable:$true] %s399_s17 }
   0x8   : > { %p1366_p3 = pnand %p1015_p0, %p336_p1  ;;  %s366_s20 = sshll.u32 %s1607_s7, 4  ;;  %s367_s20 = int_to_ptr.vmem [resolvable:$true] %s366_s20 }
   0x9   : > { %s389_s24 = sshll.u32 %s1610_s10, 4  ;;  %s409_s28 = sshll.u32 %s1612_s12, 4  ;;  %s390_s24 = int_to_ptr.vmem [resolvable:$true] %s389_s24  ;;  %s410_s28 = int_to_ptr.vmem [resolvable:$true] %s409_s28 }
   0xa   : > { %p1089_p4 = pneg %p1366_p3  ;;  %s1265_s29 = smov [#allocation5]  }
   0xb   : > { %s1266_s15 = smov [#allocation8]   ;;  %s1267_s16 = smov [#allocation3]  }
   0xc   : > { %p1380_p5 = pnand %p1105_p2, %p1089_p4  ;;  %s1268_s18 = smov [#allocation7]  }
   0xd   : > { %s1269_s19 = smov [#allocation10]  }
   0xe   : > { %1095 = dma.vmem_to_smem (!%p1380_p5), %s380_s30, 16, %s1265_s29, [#allocation6]  }
   0xf   : > { %1101 = dma.vmem_to_smem (!%p1380_p5), %s400_s17, 16, %s1266_s15, [#allocation9]  }
  0x10   : > { %1092 = dma.vmem_to_smem (!%p1380_p5), %s367_s20, 16, %s1267_s16, [#allocation4]  }
  0x11   : > { %1098 = dma.vmem_to_smem (!%p1380_p5), %s390_s24, 16, %s1268_s18, [#allocation6]  }
  0x12   : > { %1104 = dma.vmem_to_smem (!%p1380_p5), %s410_s28, 16, %s1269_s19, [#allocation9]  }
  0x13   : > { %429 = sbr.rel (%p1366_p3) target bundleno = 856 (0x358), region = 72 }
  0x18   : > { %1250 = dma.done.wait (%p1105_p2), [#allocation4], 16  }
  0x19   : > { %1252 = vsyncadd (%p1105_p2), [#allocation4], 4294967280 }
  0x1a   : > { %1254 = dma.done.wait (%p1105_p2), [#allocation6], 32  }
  0x1b   : > { %1256 = vsyncadd (%p1105_p2), [#allocation6], 4294967264 }
  0x1c   : > { %1258 = dma.done.wait (%p1105_p2), [#allocation9], 32  }
  0x1d   : > { %1260 = vsyncadd (%p1105_p2), [#allocation9], 4294967264 }
  0x1e   : > { %456 = sfence }
  0x1f   : > { %p494_p6 = scmp.lt.s32.totalorder %s1361_s14, 1  ;;  %s1270_s21 = smov 9   ;;  %v505_v1 = vlaneseq  ;;  %v1137_v3 = vld [vmem:[%s1601_s1 + $0x1] ss:$0 sm:$0xff]  ;;  %v1442_v8 = vld [vmem:[%s1601_s1 + $0x4] sm:$0x1] }
  0x20   : > { %s1271_s22 = smov 1   ;;  %s1272_s23 = smov 127   ;;  %v1138_v11 = vld [vmem:[%s1601_s1 + $0x3] ss:$0 sm:$0xff]  ;;  %v1139_v14 = vld [vmem:[%s1601_s1] ss:$0 sm:$0xff] }
  0x21   : > { %s1617_s14 = smov (!%p494_p6, %s1361_s14), 1  ;;  %s1273_s24 = smov 10   ;;  %v1433_v2 = vshrl.u32 %v505_v1, 7  ;;  %v1278_v15 = vmov 0.0   ;;  %v1140_v24 = vld [vmem:[%s1601_s1 + $0x2] ss:$0 sm:$0xff] }
  0x22   : > { %s1028_s30 = sshll.u32 %s1617_s14, 3  ;;  %s1274_s25 = smov 8   ;;  %v1141_v40 = vld [vmem:[%s1601_s1 + $0x5] ss:$0 sm:$0xff]  ;;  %v1142_v61 = vld [vmem:[%s1601_s1 + $0x7] ss:$0 sm:$0xff] }
  0x23   : > { %s497_s20 = scalar_lea.vmem %s1600_s0, %s1028_s30  ;;  %s1275_s26 = smov 119   ;;  %v507_v4 = vadd.s32 4294967295, %v1433_v2  ;;  %v513_v10 = vadd.s32 1, %v1433_v2  ;;  %vm681_vm2 = vcmask 64512  }
  0x24   : > { %v1422_v0 = vld [vmem:[%s497_s20] sm:$0xff]  ;;  %s1276_s28 = smov 120   ;;  %s1277_s29 = smov 118  }
  0x25   : > { %543 = vrot.lane.b32.xlu0 %v1422_v0, %s1270_s21  ;;  %573 = vrot.lane.b32.xlu1 %v1422_v0, %s1271_s22  ;;  %s529_s15 = sld [smem:[#allocation2]]  ;;  %vm508_vm0 = vcmp.ge.s32.totalorder %v507_v4, 0  ;;  %vm515_vm1 = vcmp.lt.s32.totalorder %v513_v10, 8  ;;  %v594_v42 = vrot.slane %v1422_v0, 7  ;;  %v604_v55 = vrot.slane %v1422_v0, 1 }
  0x26   : > { %610 = vrot.lane.b32.xlu2 %v1422_v0, %s1272_s23  ;;  %s1035_s19 = sld [smem:[#allocation3 + $0x9]]  ;;  %v1459_v16 = vsel %vm508_vm0, 1.0, %v1278_v15  ;;  %v1468_v25 = vsel %vm515_vm1, 1.0, %v1278_v15  ;;  %vm807_vm0 = vcmask 130048  }
  0x27   : > { %s1444_s17 = sld [smem:[#allocation3 + $0x1]]  ;;  %v595_v51 = vmul.f32 %v1459_v16, %v594_v42 }
  0x28   : > { %s1447_s20 = sld [smem:[#allocation3 + $0xa]] }
  0x29   : > { %s1474_s16 = sld [smem:[#allocation3 + $0xc]] }
  0x2a   : > { %s1477_s18 = sld [smem:[#allocation3 + $0x15]] }
  0x2b   : > { %v530_v9 = vstv %s529_s15  ;;  %s1471_s15 = sld [smem:[#allocation3 + $0x3]] }
  0x2c   : > { %v531_v13 = vmul.f32 %v530_v9, %v1442_v8  ;;  %v538_v18 = vstv %s1035_s19  ;;  %s1481_s19 = sld [smem:[#allocation3 + $0x4]] }
  0x2d   : > { %533 = vrot.lane.b32.xlu0 %v1422_v0, %s1273_s24  ;;  %564 = vrot.lane.b32.xlu1 %v1422_v0, %s1274_s25  ;;  %s1456_s25 = sld [smem:[#allocation3 + $0x13]]  ;;  %v550_v26 = vstv %s1444_s17 }
  0x2e   : > { %640 = vrot.lane.b32.xlu2 %v1422_v0, %s1275_s26  ;;  %s1461_s26 = sld [smem:[#allocation3 + $0xb]]  ;;  %v540_v22 = vperm.slane %v531_v13, 0  ;;  %v554_v29 = vstv %s1447_s20 }
  0x2f   : > { %s1487_s17 = sld [smem:[#allocation3 + $0xd]]  ;;  %v584_v50 = vstv %s1474_s16 }
  0x30   : > { %s1491_s20 = sld [smem:[#allocation3 + $0x16]]  ;;  %v590_v56 = vstv %s1477_s18 }
  0x31   : > { %v580_v47 = vstv %s1471_s15  ;;  %s1495_s21 = sld [smem:[#allocation3 + $0x5]] }
  0x32   : > { %v596_v57 = vstv %s1481_s19  ;;  %s1505_s24 = sld [smem:[#allocation3 + $0xe]] }
  0x33   : > { %v560_v35 = vstv %s1456_s25  ;;  %s1508_s25 = sld [smem:[#allocation3 + $0x17]] }
  0x34   : > { %v569_v36 = vstv %s1461_s26  ;;  %s1511_s26 = sld [smem:[#allocation3 + $0xf]] }
  0x35   : > { %631 = vrot.lane.b32.xlu0 %v1422_v0, %s1276_s28  ;;  %661 = vrot.lane.b32.xlu1 %v1422_v0, %s1277_s29  ;;  %v600_v62 = vstv %s1487_s17  ;;  %s1050_s28 = sld [smem:[#allocation3 + $0x7]] }
  0x36   : > { %v601_v10 = vmul.f32 %v600_v62, %v1422_v0  ;;  %s1051_s16 = sld [smem:[#allocation3 + $0x10]] }
  0x37   : > { %v617_v13 = vstv %s1495_s21  ;;  %s1052_s18 = sld [smem:[#allocation3 + $0x19]] }
  0x38   : > { %s1053_s19 = sld [smem:[#allocation3 + $0x11]] }
  0x39   : > { %s1059_s29 = sld [smem:[#allocation7 + $0x1]] }
  0x3a   : > { %s772_s15 = sld [smem:[#allocation5]] }
  0x3b   : > { %s1061_s23 = sld [smem:[#allocation10 + $0x1]] }
  0x3c   : > { %v651_v42 = vstv %s1051_s16  ;;  %s1060_s16 = sld [smem:[#allocation5 + $0x1]] }
  0x80   : > { %v611_v37 = vpop.permute.xlu2 %610 }
  0x81   : > { %v613_v49 = vmul.f32 %v1141_v40, %v611_v37 }
  0x83   : > { %v615_v60 = vrot.slane %v613_v49, 7 }
  0x88   : > { %v641_v63 = vpop.permute.xlu2 %640 }
  0x97   : > { %v544_v5 = vpop.permute.xlu0 %543  ;;  %v574_v6 = vpop.permute.xlu1 %573 }
  0x98   : > { %v546_v7 = vmul.f32 %v1137_v3, %v544_v5  ;;  %v576_v17 = vmul.f32 %v1138_v11, %v574_v6  ;;  %v597_v5 = vmul.f32 %v596_v57, %v595_v51  ;;  %v605_v6 = vmul.f32 %v1468_v25, %v604_v55  ;;  %v679_v55 = vld [vmem:[%s1603_s3] sm:$0xff] }
  0x99   : > { %v616_v11 = vmul.f32 %v1459_v16, %v615_v60 }
  0x9a   : > { %v548_v12 = vrot.slane %v546_v7, 7  ;;  %v558_v21 = vrot.slane %v546_v7, 1  ;;  %v578_v30 = vrot.slane %v576_v17, 7  ;;  %v555_v38 = vmul.f32 %v554_v29, %v546_v7 }
  0x9b   : > { %v588_v41 = vrot.slane %v576_v17, 1  ;;  %v585_v58 = vmul.f32 %v584_v50, %v576_v17  ;;  %v606_v7 = vstv %s1491_s20  ;;  %v636_v29 = vstv %s1511_s26  ;;  %s1054_s26 = sld [smem:[#allocation8 + $0x1]] }
  0x9c   : > { %v549_v20 = vmul.f32 %v1459_v16, %v548_v12  ;;  %v559_v31 = vmul.f32 %v1468_v25, %v558_v21  ;;  %v579_v43 = vmul.f32 %v1459_v16, %v578_v30  ;;  %v643_v12 = vmul.f32 %v1142_v61, %v641_v63 }
  0x9d   : > { %v589_v52 = vmul.f32 %v1468_v25, %v588_v41  ;;  %v607_v17 = vmul.f32 %v606_v7, %v605_v6 }
  0x9e   : > { %v551_v32 = vmul.f32 %v550_v26, %v549_v20  ;;  %v561_v45 = vmul.f32 %v560_v35, %v559_v31  ;;  %v581_v53 = vmul.f32 %v580_v47, %v579_v43  ;;  %v655_v35 = vrot.slane %v643_v12, 1 }
  0x9f   : > { %v534_v19 = vpop.permute.xlu0 %533  ;;  %v565_v27 = vpop.permute.xlu1 %564  ;;  %v591_v3 = vmul.f32 %v590_v56, %v589_v52  ;;  %v657_v47 = vstv %s1052_s18 }
  0xa0   : > { %v536_v23 = vmul.f32 %v1139_v14, %v534_v19  ;;  %v567_v34 = vmul.f32 %v1140_v24, %v565_v27  ;;  %v1143_v19 = vld [vmem:[%s1601_s1 + $0x6] ss:$0 sm:$0xff]  ;;  %v621_v24 = vstv %s1505_s24  ;;  %v656_v43 = vmul.f32 %v1468_v25, %v655_v35  ;;  %s817_s24 = sld [smem:[#allocation10]] }
  0xa1   : > { %v622_v31 = vmul.f32 %v621_v24, %v613_v49 }
  0xa2   : > { %v539_v28 = vmul.f32 %v538_v18, %v536_v23  ;;  %v570_v46 = vmul.f32 %v569_v36, %v567_v34  ;;  %v625_v18 = vrot.slane %v613_v49, 1  ;;  %v645_v23 = vrot.slane %v643_v12, 7 }
  0xa3   : > { %v658_v51 = vmul.f32 %v657_v47, %v656_v43 }
  0xa4   : > { %v541_v33 = vadd.f32 %v540_v22, %v539_v28  ;;  %v618_v22 = vmul.f32 %v617_v13, %v616_v11  ;;  %v626_v26 = vmul.f32 %v1468_v25, %v625_v18  ;;  %v627_v28 = vstv %s1508_s25  ;;  %s689_s25 = sld [smem:[#allocation8]] }
  0xa6   : > { %v552_v39 = vadd.f32 %v551_v32, %v541_v33  ;;  %v646_v32 = vmul.f32 %v1459_v16, %v645_v23  ;;  %v647_v33 = vstv %s1050_s28  ;;  %v628_v36 = vmul.f32 %v627_v28, %v626_v26  ;;  %s769_s28 = sld [smem:[#allocation7]] }
  0xa7   : > { %v632_v20 = vpop.permute.xlu0 %631  ;;  %v652_v16 = vmul.f32 %v651_v42, %v643_v12 }
  0xa8   : > { %v556_v44 = vadd.f32 %v555_v38, %v552_v39  ;;  %v634_v27 = vmul.f32 %v1143_v19, %v632_v20  ;;  %v1144_v38 = vld [vmem:[%s1601_s1 + $0x8] ss:$0 sm:$0xff]  ;;  %v662_v39 = vpop.permute.xlu1 %661  ;;  %v648_v40 = vmul.f32 %v647_v33, %v646_v32  ;;  %v702_v19 = vstv %s1054_s26 }
  0xaa   : > { %v562_v48 = vadd.f32 %v561_v45, %v556_v44  ;;  %v637_v37 = vmul.f32 %v636_v29, %v634_v27  ;;  %v664_v45 = vmul.f32 %v1144_v38, %v662_v39 }
  0xac   : > { %v571_v54 = vadd.f32 %v570_v46, %v562_v48  ;;  %v666_v46 = vstv %s1053_s19 }
  0xad   : > { %v667_v49 = vmul.f32 %v666_v46, %v664_v45 }
  0xae   : > { %v582_v59 = vadd.f32 %v581_v53, %v571_v54  ;;  %v1531_v53 = vld [vmem:[%s1602_s2] ss:$0 sm:$0xff] }
  0xb0   : > { %v586_v4 = vadd.f32 %v585_v58, %v582_v59  ;;  %v692_v58 = vld [vmem:[%s1604_s4] sm:$0xff] }
  0xb2   : > { %v592_v9 = vadd.f32 %v591_v3, %v586_v4 }
  0xb4   : > { %v598_v14 = vadd.f32 %v597_v5, %v592_v9 }
  0xb6   : > { %v602_v21 = vadd.f32 %v601_v10, %v598_v14  ;;  %v690_v14 = vstv %s689_s25  ;;  %s1068_s25 = sshll.u32 %s1617_s14, 4 }
  0xb8   : > { %v608_v0 = vadd.f32 %v607_v17, %v602_v21 }
  0xba   : > { %v619_v30 = vadd.f32 %v618_v22, %v608_v0 }
  0xbc   : > { %v623_v34 = vadd.f32 %v622_v31, %v619_v30 }
  0xbe   : > { %v629_v41 = vadd.f32 %v628_v36, %v623_v34 }
  0xc0   : > { %v638_v44 = vadd.f32 %v637_v37, %v629_v41 }
  0xc2   : > { %v649_v48 = vadd.f32 %v648_v40, %v638_v44 }
  0xc4   : > { %v653_v50 = vadd.f32 %v652_v16, %v649_v48 }
  0xc6   : > { %v659_v52 = vadd.f32 %v658_v51, %v653_v50 }
  0xc8   : > { %v1533_v54 = vadd.f32 %v667_v49, %v659_v52 }
  0xca   : > { %669 = vadd.xlane.f32.xlu2 %v1533_v54  ;;  %v675_v25 = vmul.f32 %v1531_v53, %v1533_v54 }
  0xcc   : > { %676 = vadd.xlane.f32.xlu0 %v675_v25 }
 0x13d   : > { %v670_v56 = vpop.xlane.xlu2 %669 }
 0x13e   : > { %v671_v57 = vmul.f32 0.012345679, %v670_v56  ;;  %v1547_v56 = vand.u32 127, %v505_v1 }
 0x13f   : > { %v677_v59 = vpop.xlane.xlu0 %676 }
 0x140   : > { %v680_v60 = vmul.f32 %v679_v55, %v671_v57  ;;  %v678_v61 = vmul.f32 0.012345679, %v677_v59  ;;  %vm521_vm11 = vcmp.eq.s32.totalorder %v1433_v2, %v1547_v56 }
 0x142   : > { %v693_v62 = vmul.f32 %v692_v58, %v678_v61  ;;  %v682_v63 = vsel %vm681_vm2, %v680_v60, 0.0 }
 0x143   : > { %v683_v3 = vrot.slane %v682_v63, 4 }
 0x144   : > { %v694_v4 = vsel %vm681_vm2, %v693_v62, 0.0 }
 0x145   : > { %v684_v5 = vadd.f32 %v683_v3, %v682_v63  ;;  %v695_v6 = vrot.slane %v694_v4, 4  ;;  %v1552_v63 = vsel %vm521_vm11, 1.0, %v1278_v15 }
 0x147   : > { %v685_v7 = vrot.slane %v684_v5, 2  ;;  %v696_v9 = vadd.f32 %v695_v6, %v694_v4 }
 0x149   : > { %v686_v10 = vadd.f32 %v685_v7, %v684_v5  ;;  %v697_v11 = vrot.slane %v696_v9, 2  ;;  %v770_v7 = vstv %s769_s28 }
 0x14b   : > { %v687_v12 = vrot.slane %v686_v10, 1  ;;  %v698_v13 = vadd.f32 %v697_v11, %v696_v9  ;;  %v779_v9 = vstv %s1059_s29  ;;  %s502_s29 = scalar_lea.vmem %s1613_s13, %s1068_s25 }
 0x14c   : > { %v780_v11 = vmul.f32 %v779_v9, %v1442_v8 }
 0x14d   : > { %v688_v17 = vadd.f32 %v687_v12, %v686_v10  ;;  %v699_v18 = vrot.slane %v698_v13, 1  ;;  %v771_v10 = vmul.f32 %v770_v7, %v1442_v8  ;;  %v773_v12 = vstv %s772_s15 }
 0x14f   : > { %v691_v20 = vadd.f32 %v690_v14, %v688_v17  ;;  %v700_v21 = vadd.f32 %v699_v18, %v698_v13  ;;  %v782_v13 = vstv %s1060_s16  ;;  %v775_v17 = vperm.slane %v771_v10, 0 }
 0x150   : > { %v784_v18 = vperm.slane %v780_v11, 0 }
 0x151   : > { %v703_v22 = vadd.f32 %v702_v19, %v700_v21  ;;  %v1055_v23 = vmul.f32 -1.442695, %v691_v20 }
 0x153   : > { %1146 = vpow2.f32 %v1055_v23  ;;  %v1056_v24 = vmul.f32 -1.442695, %v703_v22 }
 0x155   : > { %1148 = vpow2.f32 %v1056_v24 }
 0x159   : > { %v1147_v0 = vpop.eup %1146 }
 0x15a   : > { %v707_v26 = vadd.f32 1.0, %v1147_v0 }
 0x15b   : > { %v1149_v27 = vpop.eup %1148 }
 0x15c   : > { %1150 = vrcp.f32 %v707_v26  ;;  %v726_v28 = vadd.f32 1.0, %v1149_v27  ;;  %vm713_vm4 = vweird.f32 %v707_v26  ;;  %v719_v37 = vand.u32 2147483648, %v707_v26  ;;  %v820_v27 = vld [vmem:[%s1606_s6] sm:$0xff] }
 0x15d   : > { %v717_v39 = vand.u32 2147483647, %v707_v26 }
 0x15e   : > { %1152 = vrcp.f32 %v726_v28  ;;  %v738_v38 = vand.u32 2147483648, %v726_v28  ;;  %v736_v41 = vand.u32 2147483647, %v726_v28  ;;  %vm732_vm7 = vweird.f32 %v726_v28 }
 0x15f   : > { %v720_v44 = vor.u32 1.1754944e-38, %v719_v37  ;;  %vm718_vm9 = vcmp.eq.f32.partialorder %v717_v39, 8.507059e+37  ;;  %v804_v37 = vld [vmem:[%s1605_s5 + $0x8] sm:$0xff] }
 0x160   : > { %v739_v45 = vor.u32 1.1754944e-38, %v738_v38  ;;  %vm737_vm10 = vcmp.eq.f32.partialorder %v736_v41, 8.507059e+37 }
 0x162   : > { %v1151_v29 = vpop.eup %1150 }
 0x163   : > { %v709_v30 = vmul.f32 %v1151_v29, %v707_v26  ;;  %vm714_vm3 = vweird.f32 %v1151_v29 }
 0x164   : > { %v1153_v31 = vpop.eup %1152  ;;  %vm715_vm6 = vmor %vm713_vm4, %vm714_vm3 }
 0x165   : > { %v710_v32 = vsub.f32 1.0, %v709_v30  ;;  %v728_v33 = vmul.f32 %v1153_v31, %v726_v28  ;;  %vm733_vm5 = vweird.f32 %v1153_v31 }
 0x166   : > { %vm734_vm8 = vmor %vm732_vm7, %vm733_vm5 }
 0x167   : > { %v711_v34 = vmul.f32 %v1151_v29, %v710_v32  ;;  %v729_v35 = vsub.f32 1.0, %v728_v33  ;;  %v803_v33 = vld [vmem:[%s1605_s5] sm:$0xff] }
 0x169   : > { %v712_v36 = vadd.f32 %v1151_v29, %v711_v34  ;;  %v730_v40 = vmul.f32 %v1153_v31, %v729_v35 }
 0x16b   : > { %v716_v42 = vsel %vm715_vm6, %v1151_v29, %v712_v36  ;;  %v731_v43 = vadd.f32 %v1153_v31, %v730_v40 }
 0x16c   : > { %v721_v47 = vsel %vm718_vm9, %v720_v44, %v716_v42 }
 0x16d   : > { %v735_v46 = vsel %vm734_vm8, %v1153_v31, %v731_v43 }
 0x16e   : > { %v740_v16 = vsel %vm737_vm10, %v739_v45, %v735_v46 }
 0x16f   : > { %v742_v48 = vmul.f32 %v740_v16, %v721_v47 }
 0x171   : > { %v1057_v49 = vadd.f32 -0.2, %v742_v48 }
 0x173   : > { %v1058_v50 = vmul.f32 -2.0, %v1057_v49 }
 0x175   : > { %v746_v51 = vmul.f32 1.442695, %v1058_v50 }
 0x177   : > { %1154 = vpow2.f32 %v746_v51  ;;  %v834_v51 = vstv %s1061_s23 }
 0x17d   : > { %v1155_v52 = vpop.eup %1154 }
 0x17e   : > { %v748_v25 = vadd.f32 1.0, %v1155_v52 }
 0x180   : > { %1156 = vrcp.f32 %v748_v25  ;;  %v760_v59 = vand.u32 2147483648, %v748_v25  ;;  %v758_v61 = vand.u32 2147483647, %v748_v25  ;;  %vm754_vm13 = vweird.f32 %v748_v25 }
 0x182   : > { %v761_v3 = vor.u32 1.1754944e-38, %v760_v59  ;;  %vm759_vm15 = vcmp.eq.f32.partialorder %v758_v61, 8.507059e+37 }
 0x186   : > { %v1157_v55 = vpop.eup %1156 }
 0x187   : > { %v750_v57 = vmul.f32 %v1157_v55, %v748_v25  ;;  %vm755_vm12 = vweird.f32 %v1157_v55 }
 0x188   : > { %vm756_vm14 = vmor %vm754_vm13, %vm755_vm12 }
 0x189   : > { %v751_v58 = vsub.f32 1.0, %v750_v57 }
 0x18b   : > { %v752_v60 = vmul.f32 %v1157_v55, %v751_v58 }
 0x18d   : > { %v753_v62 = vadd.f32 %v1157_v55, %v752_v60  ;;  %v818_v60 = vstv %s817_s24 }
 0x18f   : > { %v757_v4 = vsel %vm756_vm14, %v1157_v55, %v753_v62 }
 0x190   : > { %v762_v1 = vsel %vm759_vm15, %v761_v3, %v757_v4 }
 0x191   : > { %v764_v5 = vmul.f32 %v1552_v63, %v762_v1 }
 0x193   : > { %v765_v6 = vsel %vm681_vm2, %v764_v5, 0.0 }
 0x194   : > { %766 = vadd.xlane.f32.xlu1 %v765_v6 }
 0x207   : > { %v767_v14 = vpop.xlane.xlu1 %766 }
 0x208   : > { %v768_v19 = vmul.f32 %v767_v14, %v1533_v54  ;;  %v821_v54 = vld [vmem:[%s1606_s6 + $0x8] sm:$0xff] }
 0x20a   : > { %v774_v20 = vmul.f32 %v773_v12, %v768_v19  ;;  %v783_v21 = vmul.f32 %v782_v13, %v768_v19 }
 0x20c   : > { %v1559_v22 = vadd.f32 %v775_v17, %v774_v20  ;;  %v1561_v23 = vadd.f32 %v784_v18, %v783_v21 }
 0x20e   : > { %789 = vadd.xlane.f32.xlu2 %v1559_v22  ;;  %v796_v24 = vmul.f32 %v1531_v53, %v1561_v23  ;;  %v795_v8 = vmul.f32 %v1531_v53, %v1559_v22 }
 0x210   : > { %799 = vadd.xlane.f32.xlu1 %v796_v24  ;;  %797 = vadd.xlane.f32.xlu0 %v795_v8 }
 0x216   : > { %791 = vadd.xlane.f32.xlu2 %v1561_v23 }
 0x281   : > { %v790_v0 = vpop.xlane.xlu2 %789 }
 0x282   : > { %v793_v31 = vmul.f32 0.012345679, %v790_v0 }
 0x283   : > { %v800_v26 = vpop.xlane.xlu1 %799  ;;  %v798_v28 = vpop.xlane.xlu0 %797 }
 0x284   : > { %v802_v29 = vmul.f32 0.012345679, %v800_v26  ;;  %v801_v30 = vmul.f32 0.012345679, %v798_v28  ;;  %v805_v39 = vmul.f32 %v803_v33, %v793_v31 }
 0x286   : > { %v823_v32 = vmul.f32 %v821_v54, %v802_v29  ;;  %v822_v53 = vmul.f32 %v820_v27, %v801_v30  ;;  %v808_v44 = vsel %vm807_vm0, %v805_v39, 0.0 }
 0x288   : > { %v825_v34 = vsel %vm807_vm0, %v823_v32, 0.0  ;;  %v824_v35 = vsel %vm807_vm0, %v822_v53, 0.0 }
 0x289   : > { %v826_v36 = vadd.f32 %v825_v34, %v824_v35  ;;  %v792_v38 = vpop.xlane.xlu2 %791 }
 0x28a   : > { %v794_v40 = vmul.f32 0.012345679, %v792_v38 }
 0x28b   : > { %v827_v41 = vrot.slane %v826_v36, 4 }
 0x28c   : > { %v806_v42 = vmul.f32 %v804_v37, %v794_v40 }
 0x28d   : > { %v828_v43 = vadd.f32 %v827_v41, %v826_v36  ;;  %v524_v36 = vadd.s32 8, %v1433_v2 }
 0x28e   : > { %v809_v45 = vsel %vm807_vm0, %v806_v42, 0.0 }
 0x28f   : > { %v829_v46 = vrot.slane %v828_v43, 2  ;;  %v810_v47 = vadd.f32 %v809_v45, %v808_v44  ;;  %vm525_vm9 = vcmp.eq.s32.totalorder %v524_v36, %v1547_v56 }
 0x291   : > { %v830_v16 = vadd.f32 %v829_v46, %v828_v43  ;;  %v811_v48 = vrot.slane %v810_v47, 4  ;;  %v1034_v43 = vsel %vm525_vm9, 1.0, %v1278_v15 }
 0x293   : > { %v831_v49 = vrot.slane %v830_v16, 1  ;;  %v812_v50 = vadd.f32 %v811_v48, %v810_v47 }
 0x295   : > { %v832_v52 = vadd.f32 %v831_v49, %v830_v16  ;;  %v813_v25 = vrot.slane %v812_v50, 2 }
 0x297   : > { %v835_v55 = vadd.f32 %v834_v51, %v832_v52  ;;  %v814_v57 = vadd.f32 %v813_v25, %v812_v50 }
 0x299   : > { %v1063_v58 = vmul.f32 -1.442695, %v835_v55  ;;  %v815_v59 = vrot.slane %v814_v57, 1 }
 0x29b   : > { %1158 = vpow2.f32 %v1063_v58  ;;  %v816_v61 = vadd.f32 %v815_v59, %v814_v57 }
 0x29d   : > { %v819_v62 = vadd.f32 %v818_v60, %v816_v61 }
 0x29f   : > { %v1062_v3 = vmul.f32 -1.442695, %v819_v62 }
 0x2a1   : > { %v1159_v4 = vpop.eup %1158  ;;  %1160 = vpow2.f32 %v1062_v3 }
 0x2a2   : > { %v858_v1 = vadd.f32 1.0, %v1159_v4 }
 0x2a4   : > { %1162 = vrcp.f32 %v858_v1  ;;  %vm864_vm2 = vweird.f32 %v858_v1  ;;  %v870_v19 = vand.u32 2147483648, %v858_v1  ;;  %v868_v24 = vand.u32 2147483647, %v858_v1 }
 0x2a6   : > { %v871_v26 = vor.u32 1.1754944e-38, %v870_v19  ;;  %vm869_vm8 = vcmp.eq.f32.partialorder %v868_v24, 8.507059e+37 }
 0x2a7   : > { %v1161_v5 = vpop.eup %1160 }
 0x2a8   : > { %v839_v6 = vadd.f32 1.0, %v1161_v5 }
 0x2aa   : > { %v1163_v7 = vpop.eup %1162  ;;  %1164 = vrcp.f32 %v839_v6  ;;  %v851_v18 = vand.u32 2147483648, %v839_v6  ;;  %v849_v21 = vand.u32 2147483647, %v839_v6  ;;  %vm845_vm5 = vweird.f32 %v839_v6 }
 0x2ab   : > { %v860_v9 = vmul.f32 %v1163_v7, %v858_v1  ;;  %vm865_vm1 = vweird.f32 %v1163_v7 }
 0x2ac   : > { %vm866_vm4 = vmor %vm864_vm2, %vm865_vm1  ;;  %v852_v54 = vor.u32 1.1754944e-38, %v851_v18  ;;  %vm850_vm7 = vcmp.eq.f32.partialorder %v849_v21, 8.507059e+37 }
 0x2ad   : > { %v861_v10 = vsub.f32 1.0, %v860_v9 }
 0x2af   : > { %v862_v11 = vmul.f32 %v1163_v7, %v861_v10 }
 0x2b0   : > { %v1165_v12 = vpop.eup %1164 }
 0x2b1   : > { %v841_v13 = vmul.f32 %v1165_v12, %v839_v6  ;;  %v863_v17 = vadd.f32 %v1163_v7, %v862_v11  ;;  %vm846_vm3 = vweird.f32 %v1165_v12 }
 0x2b2   : > { %vm847_vm6 = vmor %vm845_vm5, %vm846_vm3 }
 0x2b3   : > { %v842_v14 = vsub.f32 1.0, %v841_v13  ;;  %v867_v0 = vsel %vm866_vm4, %v1163_v7, %v863_v17 }
 0x2b4   : > { %v872_v29 = vsel %vm869_vm8, %v871_v26, %v867_v0 }
 0x2b5   : > { %v843_v20 = vmul.f32 %v1165_v12, %v842_v14 }
 0x2b7   : > { %v844_v8 = vadd.f32 %v1165_v12, %v843_v20 }
 0x2b9   : > { %v848_v27 = vsel %vm847_vm6, %v1165_v12, %v844_v8 }
 0x2ba   : > { %v853_v28 = vsel %vm850_vm7, %v852_v54, %v848_v27 }
 0x2bb   : > { %v874_v30 = vmul.f32 %v872_v29, %v853_v28 }
 0x2bd   : > { %v1064_v31 = vadd.f32 -0.2, %v874_v30 }
 0x2bf   : > { %v1065_v32 = vmul.f32 -2.0, %v1064_v31 }
 0x2c1   : > { %v878_v53 = vmul.f32 1.442695, %v1065_v32 }
 0x2c3   : > { %1166 = vpow2.f32 %v878_v53 }
 0x2c9   : > { %v1167_v33 = vpop.eup %1166 }
 0x2ca   : > { %v880_v34 = vadd.f32 1.0, %v1167_v33 }
 0x2cc   : > { %1168 = vrcp.f32 %v880_v34  ;;  %v892_v39 = vand.u32 2147483648, %v880_v34  ;;  %v890_v41 = vand.u32 2147483647, %v880_v34  ;;  %vm886_vm11 = vweird.f32 %v880_v34 }
 0x2ce   : > { %v893_v44 = vor.u32 1.1754944e-38, %v892_v39  ;;  %vm891_vm13 = vcmp.eq.f32.partialorder %v890_v41, 8.507059e+37 }
 0x2d2   : > { %v1169_v35 = vpop.eup %1168 }
 0x2d3   : > { %v882_v37 = vmul.f32 %v1169_v35, %v880_v34  ;;  %vm887_vm10 = vweird.f32 %v1169_v35 }
 0x2d4   : > { %vm888_vm12 = vmor %vm886_vm11, %vm887_vm10 }
 0x2d5   : > { %v883_v38 = vsub.f32 1.0, %v882_v37 }
 0x2d7   : > { %v884_v40 = vmul.f32 %v1169_v35, %v883_v38 }
 0x2d9   : > { %v885_v42 = vadd.f32 %v1169_v35, %v884_v40 }
 0x2db   : > { %v889_v45 = vsel %vm888_vm12, %v1169_v35, %v885_v42 }
 0x2dc   : > { %v894_v46 = vsel %vm891_vm13, %v893_v44, %v889_v45 }
 0x2dd   : > { %v897_v47 = vmul.f32 %v1034_v43, %v894_v46  ;;  %v896_v2 = vmul.f32 %v1552_v63, %v894_v46 }
 0x2df   : > { %v901_v16 = vsel %vm807_vm0, %v897_v47, 0.0  ;;  %v898_v56 = vsel %vm807_vm0, %v896_v2, 0.0 }
 0x2e0   : > { %902 = vadd.xlane.f32.xlu0 %v901_v16  ;;  %899 = vadd.xlane.f32.xlu2 %v898_v56 }
 0x353   : > { %v903_v15 = vpop.xlane.xlu0 %902  ;;  %v900_v48 = vpop.xlane.xlu2 %899 }
 0x354   : > { %v905_v49 = vmul.f32 %v903_v15, %v1561_v23  ;;  %v904_v50 = vmul.f32 %v900_v48, %v1559_v22 }
 0x356   : > { %907 = vst [vmem:[%s502_s29 + $0x8] sm:$0xff] %v905_v49 }
 0x357   : > { %906 = vst [vmem:[%s502_s29] sm:$0xff] %v904_v50 }
 0x358 PF: > { %s27_s27 = sadd.s32 1, %s1263_s27  }
 0x359   : > { %p24_p7 = scmp.ge.s32.totalorder %s27_s27, 4  }
 0x35b   :  { %26 = sbr.rel (!%p24_p7) target bundleno = 5 (0x5), region = 123 }
 0x360   :  { %929 = vsyncpa [#allocation4], 1 }
 0x361   :  { %931 = vsyncpa [#allocation4 + $0x1], 1 }
 0x362   :  { %932 = vsyncpa [#allocation6], 1 }
 0x363   :  { %933 = vsyncpa [#allocation9], 1 }

</bundles_post_ra>
